<compile_context>
chip_gen: v6e
topology: v6e:2x2x1
jax: 0.10.0
libtpu: 0.0.40
codegen_flags: <defaults>
</compile_context>

<pallas_src>
import jax
import jax.numpy as jnp
from jax.experimental import pallas as pl
from jax.experimental.pallas import tpu as pltpu


# -----------------------------------------------------------------------------
# PE table construction (the module's __init__ / register_buffer) — plain JAX.
# Build it once, in the model dtype, so the forward path never converts it.
# -----------------------------------------------------------------------------
def make_positional_encoding(d_model: int, max_len: int = 10000,
                             dtype=jnp.float32) -> jnp.ndarray:
    position = jnp.arange(0, max_len, dtype=jnp.float32)[:, None]             # (L, 1)
    div_term = jnp.exp(
        jnp.arange(0, d_model, 2, dtype=jnp.float32)
        * (-jnp.log(jnp.float32(10000.0)) / d_model)
    )                                                                          # (ceil(D/2),)
    angles = position * div_term                                               # (L, ceil(D/2))
    pe = jnp.zeros((max_len, d_model), dtype=jnp.float32)
    pe = pe.at[:, 0::2].set(jnp.sin(angles))
    # Odd d_model: cos columns number floor(D/2).
    pe = pe.at[:, 1::2].set(jnp.cos(angles)[:, : d_model // 2])
    return pe.astype(dtype)                                                    # (L, D)


# -----------------------------------------------------------------------------
# Kernels
# -----------------------------------------------------------------------------
def _pe_add_kernel(x_ref, pe_ref, o_ref):
    # x_ref / o_ref: (bB, tS, D); pe_ref: (tS, D). Same dtype; plain VPU add
    # with a free leading-dim broadcast of pe.
    o_ref[...] = x_ref[...] + pe_ref[...][None]


def _pe_add_flat_kernel(x_ref, pe_ref, o_ref):
    # x_ref / o_ref: (bB, S*D); pe_ref: (1, S*D). Lane-dense stores.
    o_ref[...] = x_ref[...] + pe_ref[...]


# -----------------------------------------------------------------------------
# Tiling / budgeting helpers
# -----------------------------------------------------------------------------
def _vmem_capacity_bytes() -> int:
    try:
        return int(pltpu.get_tpu_info().vmem_capacity_bytes)
    except Exception:
        return 64 * 1024 * 1024  # conservative (v7x per-TC VMEM)


def _sublane_multiple(dtype) -> int:
    # 8 for 4-byte, 16 for 2-byte, 32 for 1-byte dtypes.
    return max(8, 32 // jnp.dtype(dtype).itemsize)


def _vmem_limit_bytes(x_blk_bytes: int, pe_blk_bytes: int, cap: int) -> int:
    # x + out + pe blocks, double-buffered, plus compiler headroom.
    live = 2 * (2 * x_blk_bytes + pe_blk_bytes)
    return int(min(int(0.9 * cap), max(live + (8 << 20), 32 << 20)))


# -----------------------------------------------------------------------------
# Forward
# -----------------------------------------------------------------------------
def positional_encoding_forward(x: jnp.ndarray, pe: jnp.ndarray, *,
                                donate_x: bool = False,
                                target_bytes: int | None = None) -> jnp.ndarray:
    """Equivalent of PositionalEncoding.forward."""
    if x.ndim == 2:
        x = x[None, ...]
    if x.ndim != 3:
        raise ValueError(f"Input to PositionalEncoding must be 3D, got shape {x.shape}")
    B, S, D = x.shape
    max_len = pe.shape[0]
    if S > max_len:
        raise ValueError(
            f"Input sequence length {S} exceeds maximum positional encoding "
            f"length {max_len}."
        )

    itemsize = jnp.dtype(x.dtype).itemsize
    sub = _sublane_multiple(x.dtype)
    cap = _vmem_capacity_bytes()
    if target_bytes is None:
        # Generation-aware per-block target: v7x (64 MiB VMEM) -> 4 MiB,
        # v5e/v6e (128 MiB) -> 8 MiB.
        target_bytes = min(8 << 20, max(2 << 20, cap // 16))

    # Preferred path: pe was built in the model dtype. Fallback: convert only
    # the rows actually read (never the full max_len table per call).
    if pe.dtype != x.dtype:
        pe = pe[:S].astype(x.dtype)

    cost = pl.CostEstimate(
        flops=B * S * D,
        transcendentals=0,
        bytes_accessed=(2 * B * S * D + S * D) * itemsize,
    )
    alias_kwargs = {"input_output_aliases": {0: 0}} if donate_x else {}

    # -------------------------------------------------------------------------
    # Lane-dense fallback: D not a multiple of 128 -> flatten each batch row so
    # output stores are not masked per-row partial stores.
    # -------------------------------------------------------------------------
    if D % 128 != 0:
        flat_row_bytes = S * D * itemsize
        if B * flat_row_bytes <= target_bytes:
            bB = B
        else:
            bB = (target_bytes // flat_row_bytes) // 8 * 8  # 8-row block constraint
        if bB > 0:
            F = S * D
            x_flat = x.reshape(B, F)
            pe_flat = pe[:S].reshape(1, F)
            vmem_limit = _vmem_limit_bytes(bB * F * itemsize, F * itemsize, cap)
            out = pl.pallas_call(
                _pe_add_flat_kernel,
                out_shape=jax.ShapeDtypeStruct((B, F), x.dtype),
                grid_spec=pltpu.PrefetchScalarGridSpec(
                    num_scalar_prefetch=0,
                    grid=(pl.cdiv(B, bB),),
                    in_specs=[
                        pl.BlockSpec((bB, F), lambda b: (b, 0)),
                        pl.BlockSpec((1, F), lambda b: (0, 0)),
                    ],
                    out_specs=pl.BlockSpec((bB, F), lambda b: (b, 0)),
                ),
                compiler_params=pltpu.CompilerParams(
                    dimension_semantics=("parallel",),
                    vmem_limit_bytes=vmem_limit,
                ),
                cost_estimate=cost,
                **alias_kwargs,
            )(x_flat, pe_flat)
            return out.reshape(B, S, D)
        # else: rows too large for a legal flat block -> generic path below
        # (still correct, just masked stores on the ragged lane tail).

    # -------------------------------------------------------------------------
    # Main path: blocks (bB, tS, D); pe blocks (tS, D) resident across the
    # inner batch grid axis.
    # -------------------------------------------------------------------------
    row_bytes = D * itemsize
    budget_rows = max(1, target_bytes // row_bytes)
    if S <= budget_rows:
        tS = S                                       # full dim -> no sublane constraint
        bB = max(1, min(B, budget_rows // max(1, S)))  # fold batch into the block
    else:
        tS = min(S, max(sub, (budget_rows // sub) * sub))
        bB = 1

    num_s = pl.cdiv(S, tS)
    num_b = pl.cdiv(B, bB)

    # v7x: make sure a big single-block problem still has >=2 parallel grid
    # steps so both TensorCores stream (no-op on 1-TC v5e/v6e).
    if num_s * num_b == 1 and B * S * D * itemsize >= (1 << 20):
        if B >= 2:
            bB = (B + 1) // 2
        elif S >= 2 * sub:
            tS = -(-((S + 1) // 2) // sub) * sub     # ceil(S/2) rounded up to sublane
        num_s = pl.cdiv(S, tS)
        num_b = pl.cdiv(B, bB)

    # NOTE: when tS does not divide S (or S == max_len), the last seq block is
    # ragged; Pallas masks the output writeback, and the extra pe rows only get
    # added to padding, so results are unaffected (exercised in __main__).
    vmem_limit = _vmem_limit_bytes(bB * tS * D * itemsize, tS * D * itemsize, cap)

    return pl.pallas_call(
        _pe_add_kernel,
        out_shape=jax.ShapeDtypeStruct((B, S, D), x.dtype),
        grid_spec=pltpu.PrefetchScalarGridSpec(
            num_scalar_prefetch=0,
            # Batch is the inner (fast) axis: pe's block index only depends on
            # the outer seq-tile index, so its re-DMA is skipped across batches.
            grid=(num_s, num_b),
            in_specs=[
                pl.BlockSpec((bB, tS, D), lambda s, b: (b, s, 0)),
                pl.BlockSpec((tS, D), lambda s, b: (s, 0)),
            ],
            out_specs=pl.BlockSpec((bB, tS, D), lambda s, b: (b, s, 0)),
        ),
        compiler_params=pltpu.CompilerParams(
            dimension_semantics=("parallel", "parallel"),
            vmem_limit_bytes=vmem_limit,
        ),
        cost_estimate=cost,
        **alias_kwargs,
    )(x, pe)


if __name__ == "__main__":
    key = jax.random.PRNGKey(0)

    # 1) Basic 3-D path: B=2, S=8, D=128 (lane-dense), max_len=64.
    B, S, D, MAX_LEN = 2, 8, 128, 64
    x = jax.random.normal(key, (B, S, D), dtype=jnp.float32)
    pe = make_positional_encoding(D, MAX_LEN)            # built in model dtype
    out = jax.block_until_ready(positional_encoding_forward(x, pe))
    ref = x + pe[None, :S, :]
    assert out.shape == (B, S, D)
    assert jnp.allclose(out, ref, atol=1e-6), "mismatch vs reference (3D)"

    # 2) 2-D input branch (x.unsqueeze(0) in PyTorch).
    x2d = jax.random.normal(jax.random.PRNGKey(1), (S, D), dtype=jnp.float32)
    out2 = jax.block_until_ready(positional_encoding_forward(x2d, pe))
    ref2 = x2d[None, ...] + pe[None, :S, :]
    assert out2.shape == (1, S, D)
    assert jnp.allclose(out2, ref2, atol=1e-6), "mismatch vs reference (2D)"

    # 3) Forced multi-tile grid with a ragged last seq block (S not a multiple
    #    of tS): tiny target_bytes -> tS=8, 3 seq tiles for S=20.
    S3 = 20
    x3 = jax.random.normal(jax.random.PRNGKey(2), (B, S3, D), dtype=jnp.float32)
    out3 = jax.block_until_ready(
        positional_encoding_forward(x3, pe, target_bytes=4096))
    ref3 = x3 + pe[None, :S3, :]
    assert jnp.allclose(out3, ref3, atol=1e-6), "mismatch vs reference (tiled/ragged)"

    # 4) Lane-dense flattened path: odd d_model, D not a multiple of 128.
    D4 = 95
    pe4 = make_positional_encoding(D4, MAX_LEN)
    x4 = jax.random.normal(jax.random.PRNGKey(3), (B, S, D4), dtype=jnp.float32)
    out4 = jax.block_until_ready(positional_encoding_forward(x4, pe4))
    ref4 = x4 + pe4[None, :S, :]
    assert out4.shape == (B, S, D4)
    assert jnp.allclose(out4, ref4, atol=1e-6), "mismatch vs reference (flat/odd D)"

    print("KERNEL_OK")
</pallas_src>

<mosaic_0001>
module attributes {stable_mosaic.version = 11 : i64} {
  func.func @_pe_add_kernel(%arg0: i32, %arg1: i32, %arg2: memref<2x8x128xf32, #tpu.memory_space<vmem>>, %arg3: memref<8x128xf32, #tpu.memory_space<vmem>>, %arg4: memref<2x8x128xf32, #tpu.memory_space<vmem>>) attributes {dimension_semantics = [#tpu.dimension_semantics<parallel>, #tpu.dimension_semantics<parallel>], iteration_bounds = array<i64: 1, 1>, scalar_prefetch = 0 : i64, scratch_operands = 0 : i64, tpu.core_type = #tpu.core_type<tc>, window_params = [{transform_indices = @transform_0, window_bounds = array<i64: 2, 8, 128>}, {transform_indices = @transform_1, window_bounds = array<i64: 8, 128>}, {transform_indices = @transform_2, window_bounds = array<i64: 2, 8, 128>}]} {
    %c0 = arith.constant 0 : index
    %c0_0 = arith.constant 0 : index
    %c0_1 = arith.constant 0 : index
    %0 = vector.load %arg2[%c0, %c0_0, %c0_1] : memref<2x8x128xf32, #tpu.memory_space<vmem>>, vector<2x8x128xf32>
    %c0_2 = arith.constant 0 : index
    %c0_3 = arith.constant 0 : index
    %1 = vector.load %arg3[%c0_2, %c0_3] : memref<8x128xf32, #tpu.memory_space<vmem>>, vector<8x128xf32>
    %2 = vector.shape_cast %1 : vector<8x128xf32> to vector<1x8x128xf32>
    %3 = vector.broadcast %2 : vector<1x8x128xf32> to vector<2x8x128xf32>
    %4 = arith.addf %0, %3 : vector<2x8x128xf32>
    %c0_4 = arith.constant 0 : index
    %c0_5 = arith.constant 0 : index
    %c0_6 = arith.constant 0 : index
    %5 = vector.load %arg4[%c0_4, %c0_5, %c0_6] : memref<2x8x128xf32, #tpu.memory_space<vmem>>, vector<2x8x128xf32>
    tpu.vector_store %arg4[%c0_4, %c0_5, %c0_6], %4 {strides = array<i32>} : memref<2x8x128xf32, #tpu.memory_space<vmem>>, vector<2x8x128xf32>,
    return
  }
  func.func @transform_0(%arg0: i32, %arg1: i32) -> (i32, i32, i32) {
    %c0_i32 = arith.constant 0 : i32
    %c0_i32_0 = arith.constant 0 : i32
    return %arg1, %arg0, %c0_i32 : i32, i32, i32
  }
  func.func @transform_1(%arg0: i32, %arg1: i32) -> (i32, i32) {
    %c0_i32 = arith.constant 0 : i32
    %c0_i32_0 = arith.constant 0 : i32
    return %arg0, %c0_i32 : i32, i32
  }
  func.func @transform_2(%arg0: i32, %arg1: i32) -> (i32, i32, i32) {
    %c0_i32 = arith.constant 0 : i32
    %c0_i32_0 = arith.constant 0 : i32
    return %arg1, %arg0, %c0_i32 : i32, i32, i32
  }
}

</mosaic_0001>

<bundles_post_ra>
// kernel: tpu_custom_call.1
= control target key start
LH: loop header
LB: loop body
LE: loop exit
PB: predicated region body
PF: predicated region fallthrough
CT: control target
= control target key end

     0   :  { %7 = vsyncpa [#allocation3], 0  ;;  %s169_s0 = inlined_call_operand.hbm [shape: f32[2,8,128], index: 0, kind: input, shape index: {}]   ;;  %s170_s1 = inlined_call_operand.hbm [shape: f32[64,128], index: 1, kind: input, shape index: {}]   ;;  %s171_s2 = inlined_call_operand.hbm [shape: f32[2,8,128], index: 2, kind: output, shape index: {}]  }
   0x1   :  { %8 = vsyncpa [#allocation6], 0 }
   0x2   :  { %9 = vsyncpa [#allocation4], 0  ;;  %s134_s9 = smov [#allocation2]  }
   0x3   :  { %s15_s10 = sshll.u32 %s134_s9, 4  ;;  %s16_s10 = int_to_ptr.vmem [resolvable:$true] %s15_s10 }
   0x4   :  { %s76_s11 = scalar_lea.vmem %s16_s10, 256  ;;  %p81_p1 = scmp.lt.s32.totalorder %s16_s10, %s16_s10 }
   0x5   :  { %p77_p0 = scmp.ne.s32.totalorder %s16_s10, %s76_s11  ;;  %p82_p2 = scmp.lt.s32.totalorder %s76_s11, %s76_s11 }
   0x7   :  { %p83_p3 = por %p82_p2, %p81_p1 }
   0x9   :  { %p84_p4 = pnand %p83_p3, %p77_p0 }
   0xb   :  { %87 = shalt.err (!%p84_p4)
}
   0xc   :  { %s135_s12 = smov 128   ;;  %s136_s13 = smov 8  }
   0xd   :  { %21 = dma.hbm_to_vmem [thread:$0]  %s169_s0, 256, %s16_s10, [#allocation3], %s135_s12, %s135_s12, %s136_s13  }
   0xe   :  { %s137_s16 = smov [#allocation5]  }
   0xf   :  { %s28_s17 = sshll.u32 %s137_s16, 4  ;;  %s29_s17 = int_to_ptr.vmem [resolvable:$true] %s28_s17 }
  0x10   :  { %s96_s18 = scalar_lea.vmem %s29_s17, 128  ;;  %p101_p6 = scmp.lt.s32.totalorder %s29_s17, %s29_s17 }
  0x11   :  { %p97_p5 = scmp.ne.s32.totalorder %s29_s17, %s96_s18  ;;  %p102_p7 = scmp.lt.s32.totalorder %s96_s18, %s96_s18 }
  0x13   :  { %p103_p8 = por %p102_p7, %p101_p6 }
  0x15   :  { %p104_p9 = pnand %p103_p8, %p97_p5 }
  0x17   :  { %107 = shalt.err (!%p104_p9)
}
  0x18   :  { %31 = dma.hbm_to_vmem [thread:$0]  %s170_s1, 128, %s29_s17, [#allocation6]  }
  0x19   :  { %128 = dma.done.wait [#allocation3], 256  }
  0x1a   :  { %129 = vsyncadd [#allocation3], 4294967040 }
  0x1b   :  { %130 = dma.done.wait [#allocation6], 128  }
  0x1c   :  { %131 = vsyncadd [#allocation6], 4294967168  ;;  %s138_s21 = smov [#allocation7]   ;;  %v38_v0 = vld [vmem:[#allocation2] sm:$0xff]  ;;  %v40_v1 = vld [vmem:[#allocation5] sm:$0xff] }
  0x1d   :  { %s50_s0 = sshll.u32 %s138_s21, 4  ;;  %v39_v2 = vld [vmem:[#allocation2 + $0x8] sm:$0xff]  ;;  %v41_v3 = vadd.f32 %v40_v1, %v38_v0  ;;  %s51_s0 = int_to_ptr.vmem [resolvable:$true] %s50_s0 }
  0x1e   :  { %v42_v4 = vadd.f32 %v40_v1, %v39_v2  ;;  %s108_s22 = scalar_lea.vmem %s51_s0, 256  ;;  %p113_p11 = scmp.lt.s32.totalorder %s51_s0, %s51_s0 }
  0x1f   :  { %43 = vst [vmem:[#allocation7] sm:$0xff] %v41_v3  ;;  %p109_p10 = scmp.ne.s32.totalorder %s51_s0, %s108_s22  ;;  %p114_p12 = scmp.lt.s32.totalorder %s108_s22, %s108_s22 }
  0x20   :  { %44 = vst [vmem:[#allocation7 + $0x8] sm:$0xff] %v42_v4 }
  0x21   :  { %p115_p13 = por %p114_p12, %p113_p11 }
  0x23   :  { %p116_p0 = pnand %p115_p13, %p109_p10 }
  0x25   :  { %119 = shalt.err (!%p116_p0)
}
  0x26   :  { %56 = dma.vmem_to_hbm [thread:$0]  %s51_s0, 256, %s171_s2, [#allocation4], %s135_s12, %s135_s12, %s136_s13  }
  0x27   :  { %132 = dma.done.wait [#allocation4], 256  }
  0x28   :  { %133 = vsyncadd [#allocation4], 4294967040 }
  0x29   :  { %60 = vsyncpa [#allocation3], 1 }
  0x2a   :  { %61 = vsyncpa [#allocation6], 1 }
  0x2b   :  { %62 = vsyncpa [#allocation4], 1 }

</bundles_post_ra>
